<compile_context>
chip_gen: v7x
topology: tpu7x:2x2x1
jax: 0.10.0
libtpu: 0.0.40
codegen_flags: <defaults>
</compile_context>

<pallas_src>
import functools

import jax
import jax.numpy as jnp
from jax.experimental import pallas as pl
from jax.experimental.pallas import tpu as pltpu

EPS = 1e-5                  # nn.InstanceNorm1d default eps
LANE = 128                  # padded lane width for every hidden / output layer
ROW = 16                    # batch-tile row granularity (bf16 native sublane tile)
X_BF16_MIN_F = 512          # ship x as bf16 once the input width reaches this
SINGLE_BUFFER_MIN_F = 2048  # single-buffer the W1 slab once it is big enough to matter


def _round_up(n, m):
    return ((n + m - 1) // m) * m


def _cdiv(a, b):
    return -(-a // b)


# ---------------------------------------------------------------------------
# Kernel
# ---------------------------------------------------------------------------
def _mlp_kernel(wc_ref,      # scalar-prefetch (SMEM): selected wc index
                x_ref,       # (TB, F)            f32 or bf16
                w1_ref,      # (1, F, 128)        bf16  (layer-1 weight, out-padded)
                ws_ref,      # (1, 4*128, 128)    bf16  (layers 2..5, 128x128 each)
                b_ref,       # (1, 5, 128)        f32   (all biases, lane-padded)
                out_ref,     # (TB, 128)          bf16  (lane-padded output)
                *, bf16_tanh):
    del wc_ref  # work-center selection already happened via the index_maps

    # ---- InstanceNorm1d over the feature axis: one-pass stats in f32. ----
    x = x_ref[...].astype(jnp.float32)
    inv_f = 1.0 / x.shape[-1]
    s = jnp.sum(x, axis=-1, keepdims=True)
    ss = jnp.sum(x * x, axis=-1, keepdims=True)
    mean = s * inv_f
    var = jnp.maximum(ss * inv_f - mean * mean, 0.0)     # population variance
    h = ((x - mean) * jax.lax.rsqrt(var + EPS)).astype(jnp.bfloat16)

    b = b_ref[0]                                         # (5, 128) f32, tiny

    def act(z, i):
        zb = z + b[i:i + 1, :]
        if bf16_tanh:                                    # bf16 EUP (v6e / v7x)
            return jnp.tanh(zb.astype(jnp.bfloat16))
        return jnp.tanh(zb).astype(jnp.bfloat16)         # f32 EUP (v5e and older)

    # ---- Layer 1: the only matmul with a real K (=F) dimension. ----
    h = act(jnp.dot(h, w1_ref[0], preferred_element_type=jnp.float32), 0)

    # ---- Layers 2..4: 128x128 bf16 blocks from the VMEM-resident slab. ----
    for layer in range(3):
        w = ws_ref[0, layer * LANE:(layer + 1) * LANE, :]
        h = act(jnp.dot(h, w, preferred_element_type=jnp.float32), layer + 1)

    # ---- Layer 5 (no activation): lane-dense bf16 padded store. ----
    w5 = ws_ref[0, 3 * LANE:4 * LANE, :]
    z = jnp.dot(h, w5, preferred_element_type=jnp.float32) + b[4:5, :]
    out_ref[...] = z.astype(out_ref.dtype)


# ---------------------------------------------------------------------------
# Generation-aware sizing helpers
# ---------------------------------------------------------------------------
def _vmem_target_bytes():
    """Scoped-VMEM we are willing to request (<= ~half of physical)."""
    try:
        phys = int(pltpu.get_tpu_info().vmem_capacity_bytes)
    except Exception:
        phys = 64 << 20          # conservative fallback (v7x per-TC)
    return max(16 << 20, min(48 << 20, phys // 2))


def _bf16_tanh_ok():
    """bf16 EUP exists on v6e/v7x; fall back to f32 tanh on older generations."""
    try:
        kind = jax.devices()[0].device_kind.lower()
    except Exception:
        return True
    return not any(old in kind for old in ("v2", "v3", "v4", "v5"))


def _weight_bytes(f):
    """Conservative (double-buffered) footprint of the three parameter slabs."""
    return 2 * (f * LANE * 2 + 4 * LANE * LANE * 2 + 5 * LANE * 4)


def _pick_tb(n, f, x_itemsize, out_itemsize, vmem_target, weight_bytes):
    """Batch tile: multiple of 16, <=4096, >=2 grid steps when N allows, and
    the double-buffered x/out tiles kept within the generation-aware budget."""
    cap = min(4096, _round_up(n, ROW))
    if n >= 2 * ROW:                       # keep >=2 grid steps (pipelining, v7x 2 TCs)
        cap = min(cap, _round_up(_cdiv(n, 2), ROW))
    bytes_per_row = 2 * (x_itemsize * f + out_itemsize * LANE)   # double-buffered x+out
    budget = max(1 << 20, vmem_target - weight_bytes - (4 << 20))
    max_rows = max(ROW, budget // bytes_per_row)
    tb = min(cap, (max_rows // ROW) * ROW)
    return max(ROW, tb), bytes_per_row


def _param_spec(shape, index_map, single_buffer):
    """Parameter slab whose block index never changes across the batch grid."""
    if single_buffer:
        try:
            return pl.BlockSpec(shape, index_map, pipeline_mode=pl.Buffered(1))
        except Exception:
            pass
    return pl.BlockSpec(shape, index_map)


def _pack_params(Ws, Bs):
    """Pack per-wc parameters into 3 lane-padded slabs (bf16 weights, f32 biases)."""
    wc_no = Ws[0].shape[0]
    f_in = Ws[0].shape[1]

    w1 = jnp.zeros((wc_no, f_in, LANE), jnp.float32)
    w1 = w1.at[:, :, :Ws[0].shape[2]].set(Ws[0]).astype(jnp.bfloat16)

    blocks = []
    for W in Ws[1:]:
        k_in, k_out = W.shape[1], W.shape[2]
        wp = jnp.zeros((wc_no, LANE, LANE), jnp.float32)
        blocks.append(wp.at[:, :k_in, :k_out].set(W))
    wslab = jnp.concatenate(blocks, axis=1).astype(jnp.bfloat16)   # (wc_no, 512, 128)

    brows = []
    for bvec in Bs:
        bp = jnp.zeros((wc_no, 1, LANE), jnp.float32)
        brows.append(bp.at[:, 0, :bvec.shape[1]].set(bvec))
    bslab = jnp.concatenate(brows, axis=1)                          # (wc_no, 5, 128)
    return w1, wslab, bslab


# ---------------------------------------------------------------------------
# Wrapper
# ---------------------------------------------------------------------------
def forward(x, wc_idx, Ws, Bs, *, x_bf16=None):
    """x: (N, 1, input_size) f32.  Ws[i]: (wc_no, in, out);  Bs[i]: (wc_no, out)."""
    N, C, F = x.shape
    assert C == 1, "module is used with a single channel (NCL, C=1)"
    out_size = Ws[-1].shape[-1]
    assert out_size <= LANE, "output_size must be <= 128 for the lane-padded path"

    if x_bf16 is None:
        x_bf16 = F >= X_BF16_MIN_F     # halve the input stream when it dominates
    x_dtype = jnp.bfloat16 if x_bf16 else jnp.float32
    out_dtype = jnp.bfloat16           # halve the 128-lane padded writeback
    bf16_tanh = _bf16_tanh_ok()

    x2 = x.reshape(N, F).astype(x_dtype)

    vmem_target = _vmem_target_bytes()
    weight_bytes = _weight_bytes(F)
    TB, bytes_per_row = _pick_tb(N, F,
                                 jnp.dtype(x_dtype).itemsize,
                                 jnp.dtype(out_dtype).itemsize,
                                 vmem_target, weight_bytes)
    N_pad = _round_up(N, TB)
    if N_pad != N:
        x2 = jnp.pad(x2, ((0, N_pad - N), (0, 0)))   # zero rows: harmless, sliced off

    w1, wslab, bslab = _pack_params(Ws, Bs)
    wc = jnp.asarray([wc_idx], dtype=jnp.int32)

    single_buffer = F >= SINGLE_BUFFER_MIN_F

    grid_spec = pltpu.PrefetchScalarGridSpec(
        num_scalar_prefetch=1,
        grid=(N_pad // TB,),
        in_specs=[
            pl.BlockSpec((TB, F), lambda i, wc_s: (i, 0)),
            _param_spec((1, F, LANE), lambda i, wc_s: (wc_s[0], 0, 0), single_buffer),
            _param_spec((1, 4 * LANE, LANE), lambda i, wc_s: (wc_s[0], 0, 0), single_buffer),
            _param_spec((1, 5, LANE), lambda i, wc_s: (wc_s[0], 0, 0), single_buffer),
        ],
        out_specs=pl.BlockSpec((TB, LANE), lambda i, wc_s: (i, 0)),
    )

    # Explicit, computed VMEM limit (footprint + headroom, never above target).
    footprint = weight_bytes + TB * bytes_per_row
    vmem_limit = int(min(vmem_target, _round_up(footprint + (4 << 20), 1 << 20)))

    flops = 2 * N_pad * (F * LANE + 4 * LANE * LANE)
    transcendentals = N_pad * (4 * LANE + 1)
    bytes_accessed = (N_pad * (jnp.dtype(x_dtype).itemsize * F
                               + jnp.dtype(out_dtype).itemsize * LANE)
                      + int(w1.nbytes) + int(wslab.nbytes) + int(bslab.nbytes))

    out_padded = pl.pallas_call(
        functools.partial(_mlp_kernel, bf16_tanh=bf16_tanh),
        out_shape=jax.ShapeDtypeStruct((N_pad, LANE), out_dtype),
        grid_spec=grid_spec,
        compiler_params=pltpu.CompilerParams(
            dimension_semantics=("parallel",),
            vmem_limit_bytes=vmem_limit),
        cost_estimate=pl.CostEstimate(
            flops=int(flops),
            transcendentals=int(transcendentals),
            bytes_accessed=int(bytes_accessed)),
    )(wc, x2, w1, wslab, bslab)

    return out_padded[:N, :out_size].astype(jnp.float32)


# ---------------------------------------------------------------------------
# Deterministic parameter initialization (PyTorch nn.Linear default init:
# U(-1/sqrt(fan_in), 1/sqrt(fan_in)) for weight and bias).
# ---------------------------------------------------------------------------
def _init_linear(key, fan_in, fan_out):
    kw, kb = jax.random.split(key)
    bound = 1.0 / float(fan_in) ** 0.5
    w = jax.random.uniform(kw, (fan_in, fan_out), jnp.float32, -bound, bound)
    b = jax.random.uniform(kb, (fan_out,), jnp.float32, -bound, bound)
    return w, b


def build_params(key, input_size, output_size, wc_no):
    dims = [(input_size, 32), (32, 32), (32, 16), (16, 8), (8, output_size)]
    keys = jax.random.split(key, len(dims))
    Ws, Bs = [], []
    for k, (fi, fo) in zip(keys, dims):
        w, b = _init_linear(k, fi, fo)
        # copy.deepcopy in the torch module -> every work-center network starts
        # from the SAME weights; replicate along the leading wc axis.
        Ws.append(jnp.broadcast_to(w[None], (wc_no, fi, fo)).copy())
        Bs.append(jnp.broadcast_to(b[None], (wc_no, fo)).copy())
    return Ws, Bs


def _reference(x, wc_idx, Ws, Bs, *, bf16_tanh, x_dtype, out_dtype):
    """Same math as the kernel (one-pass stats, bf16 MXU operands, f32 acc,
    bf16 output rounding), so it is a tight correctness oracle."""
    N, _, F = x.shape
    xq = x.reshape(N, F).astype(x_dtype).astype(jnp.float32)
    mean = jnp.mean(xq, axis=-1, keepdims=True)
    var = jnp.maximum(jnp.mean(xq * xq, axis=-1, keepdims=True) - mean * mean, 0.0)
    h = ((xq - mean) * jax.lax.rsqrt(var + EPS)).astype(jnp.bfloat16)
    for i, (W, b) in enumerate(zip(Ws, Bs)):
        z = jnp.dot(h, W[wc_idx].astype(jnp.bfloat16),
                    preferred_element_type=jnp.float32) + b[wc_idx]
        if i < len(Ws) - 1:
            h = (jnp.tanh(z.astype(jnp.bfloat16)) if bf16_tanh
                 else jnp.tanh(z).astype(jnp.bfloat16))
        else:
            h = z.astype(out_dtype).astype(jnp.float32)
    return h


if __name__ == "__main__":
    batch = 2
    input_size = 16
    output_size = 4
    wc_no = 3
    wc_idx = 1

    key = jax.random.PRNGKey(0)
    kx, kp = jax.random.split(key)
    x = jax.random.normal(kx, (batch, 1, input_size), dtype=jnp.float32)
    Ws, Bs = build_params(kp, input_size, output_size, wc_no)

    out = jax.block_until_ready(forward(x, wc_idx, Ws, Bs))

    ref = _reference(
        x, wc_idx, Ws, Bs,
        bf16_tanh=_bf16_tanh_ok(),
        x_dtype=jnp.float32 if input_size < X_BF16_MIN_F else jnp.bfloat16,
        out_dtype=jnp.bfloat16)

    assert out.shape == (batch, output_size)
    assert jnp.allclose(out, ref, atol=2e-3, rtol=2e-3), (out, ref)
    print("KERNEL_OK")
</pallas_src>

<mosaic_0001>
module attributes {stable_mosaic.version = 11 : i64} {
  func.func @_mlp_kernel(%arg0: i32, %arg1: memref<1xi32, #tpu.memory_space<smem>>, %arg2: memref<16x16xf32, #tpu.memory_space<vmem>>, %arg3: memref<1x16x128xbf16, #tpu.memory_space<vmem>>, %arg4: memref<1x512x128xbf16, #tpu.memory_space<vmem>>, %arg5: memref<1x5x128xf32, #tpu.memory_space<vmem>>, %arg6: memref<16x128xbf16, #tpu.memory_space<vmem>>) attributes {dimension_semantics = [#tpu.dimension_semantics<parallel>], iteration_bounds = array<i64: 1>, scalar_prefetch = 1 : i64, scratch_operands = 0 : i64, tpu.core_type = #tpu.core_type<tc>, window_params = [{transform_indices = @transform_0, window_bounds = array<i64: 16, 16>}, {transform_indices = @transform_1, window_bounds = array<i64: 1, 16, 128>}, {transform_indices = @transform_2, window_bounds = array<i64: 1, 512, 128>}, {transform_indices = @transform_3, window_bounds = array<i64: 1, 5, 128>}, {transform_indices = @transform_4, window_bounds = array<i64: 16, 128>}]} {
    %c0 = arith.constant 0 : index
    %c0_0 = arith.constant 0 : index
    %0 = vector.load %arg2[%c0, %c0_0] : memref<16x16xf32, #tpu.memory_space<vmem>>, vector<16x16xf32>
    %cst = arith.constant dense<0.000000e+00> : vector<16xf32>
    %1 = vector.multi_reduction <add>, %0, %cst [1] : vector<16x16xf32> to vector<16xf32>
    %2 = vector.shape_cast %1 : vector<16xf32> to vector<16x1xf32>
    %3 = arith.mulf %0, %0 : vector<16x16xf32>
    %cst_1 = arith.constant dense<0.000000e+00> : vector<16xf32>
    %4 = vector.multi_reduction <add>, %3, %cst_1 [1] : vector<16x16xf32> to vector<16xf32>
    %5 = vector.shape_cast %4 : vector<16xf32> to vector<16x1xf32>
    %cst_2 = arith.constant 6.250000e-02 : f32
    %6 = vector.broadcast %cst_2 : f32 to vector<16x1xf32>
    %7 = arith.mulf %2, %6 : vector<16x1xf32>
    %cst_3 = arith.constant 6.250000e-02 : f32
    %8 = vector.broadcast %cst_3 : f32 to vector<16x1xf32>
    %9 = arith.mulf %5, %8 : vector<16x1xf32>
    %10 = arith.mulf %7, %7 : vector<16x1xf32>
    %11 = arith.subf %9, %10 : vector<16x1xf32>
    %cst_4 = arith.constant 0.000000e+00 : f32
    %12 = vector.broadcast %cst_4 : f32 to vector<16x1xf32>
    %13 = arith.maximumf %11, %12 : vector<16x1xf32>
    %14 = vector.broadcast %7 : vector<16x1xf32> to vector<16x16xf32>
    %15 = arith.subf %0, %14 : vector<16x16xf32>
    %cst_5 = arith.constant 9.99999974E-6 : f32
    %16 = vector.broadcast %cst_5 : f32 to vector<16x1xf32>
    %17 = arith.addf %13, %16 : vector<16x1xf32>
    %18 = math.rsqrt %17 : vector<16x1xf32>
    %19 = vector.broadcast %18 : vector<16x1xf32> to vector<16x16xf32>
    %20 = arith.mulf %15, %19 : vector<16x16xf32>
    %21 = arith.truncf %20 : vector<16x16xf32> to vector<16x16xbf16>
    %c0_6 = arith.constant 0 : index
    %c0_7 = arith.constant 0 : index
    %c0_8 = arith.constant 0 : index
    %22 = vector.load %arg5[%c0_6, %c0_7, %c0_8] : memref<1x5x128xf32, #tpu.memory_space<vmem>>, vector<1x5x128xf32>
    %23 = vector.shape_cast %22 : vector<1x5x128xf32> to vector<5x128xf32>
    %c0_9 = arith.constant 0 : index
    %c0_10 = arith.constant 0 : index
    %c0_11 = arith.constant 0 : index
    %24 = vector.load %arg3[%c0_9, %c0_10, %c0_11] : memref<1x16x128xbf16, #tpu.memory_space<vmem>>, vector<1x16x128xbf16>
    %25 = vector.shape_cast %24 : vector<1x16x128xbf16> to vector<16x128xbf16>
    %cst_12 = arith.constant dense<0.000000e+00> : vector<16x128xf32>
    %26 = tpu.matmul %21, %25, %cst_12 {dimension_numbers = #tpu.dot_dimension_numbers<[1], [0], [0], [1], [0, 0, 1, 1], [], []>} : vector<16x16xbf16>, vector<16x128xbf16>, vector<16x128xf32> -> vector<16x128xf32>
    %27 = vector.extract_strided_slice %23 {offsets = [0, 0], sizes = [1, 128], strides = [1, 1]} : vector<5x128xf32> to vector<1x128xf32>
    %28 = vector.broadcast %27 : vector<1x128xf32> to vector<16x128xf32>
    %29 = arith.addf %26, %28 : vector<16x128xf32>
    %30 = arith.truncf %29 : vector<16x128xf32> to vector<16x128xbf16>
    %31 = math.tanh %30 : vector<16x128xbf16>
    %c0_13 = arith.constant 0 : index
    %c0_14 = arith.constant 0 : index
    %c0_15 = arith.constant 0 : index
    %32 = vector.load %arg4[%c0_13, %c0_14, %c0_15] : memref<1x512x128xbf16, #tpu.memory_space<vmem>>, vector<1x128x128xbf16>
    %33 = vector.shape_cast %32 : vector<1x128x128xbf16> to vector<128x128xbf16>
    %cst_16 = arith.constant dense<0.000000e+00> : vector<16x128xf32>
    %34 = tpu.matmul %31, %33, %cst_16 {dimension_numbers = #tpu.dot_dimension_numbers<[1], [0], [0], [1], [0, 0, 1, 1], [], []>} : vector<16x128xbf16>, vector<128x128xbf16>, vector<16x128xf32> -> vector<16x128xf32>
    %35 = vector.extract_strided_slice %23 {offsets = [1, 0], sizes = [1, 128], strides = [1, 1]} : vector<5x128xf32> to vector<1x128xf32>
    %36 = vector.broadcast %35 : vector<1x128xf32> to vector<16x128xf32>
    %37 = arith.addf %34, %36 : vector<16x128xf32>
    %38 = arith.truncf %37 : vector<16x128xf32> to vector<16x128xbf16>
    %39 = math.tanh %38 : vector<16x128xbf16>
    %c0_17 = arith.constant 0 : index
    %c128 = arith.constant 128 : index
    %c0_18 = arith.constant 0 : index
    %40 = vector.load %arg4[%c0_17, %c128, %c0_18] : memref<1x512x128xbf16, #tpu.memory_space<vmem>>, vector<1x128x128xbf16>
    %41 = vector.shape_cast %40 : vector<1x128x128xbf16> to vector<128x128xbf16>
    %cst_19 = arith.constant dense<0.000000e+00> : vector<16x128xf32>
    %42 = tpu.matmul %39, %41, %cst_19 {dimension_numbers = #tpu.dot_dimension_numbers<[1], [0], [0], [1], [0, 0, 1, 1], [], []>} : vector<16x128xbf16>, vector<128x128xbf16>, vector<16x128xf32> -> vector<16x128xf32>
    %43 = vector.extract_strided_slice %23 {offsets = [2, 0], sizes = [1, 128], strides = [1, 1]} : vector<5x128xf32> to vector<1x128xf32>
    %44 = vector.broadcast %43 : vector<1x128xf32> to vector<16x128xf32>
    %45 = arith.addf %42, %44 : vector<16x128xf32>
    %46 = arith.truncf %45 : vector<16x128xf32> to vector<16x128xbf16>
    %47 = math.tanh %46 : vector<16x128xbf16>
    %c0_20 = arith.constant 0 : index
    %c256 = arith.constant 256 : index
    %c0_21 = arith.constant 0 : index
    %48 = vector.load %arg4[%c0_20, %c256, %c0_21] : memref<1x512x128xbf16, #tpu.memory_space<vmem>>, vector<1x128x128xbf16>
    %49 = vector.shape_cast %48 : vector<1x128x128xbf16> to vector<128x128xbf16>
    %cst_22 = arith.constant dense<0.000000e+00> : vector<16x128xf32>
    %50 = tpu.matmul %47, %49, %cst_22 {dimension_numbers = #tpu.dot_dimension_numbers<[1], [0], [0], [1], [0, 0, 1, 1], [], []>} : vector<16x128xbf16>, vector<128x128xbf16>, vector<16x128xf32> -> vector<16x128xf32>
    %51 = vector.extract_strided_slice %23 {offsets = [3, 0], sizes = [1, 128], strides = [1, 1]} : vector<5x128xf32> to vector<1x128xf32>
    %52 = vector.broadcast %51 : vector<1x128xf32> to vector<16x128xf32>
    %53 = arith.addf %50, %52 : vector<16x128xf32>
    %54 = arith.truncf %53 : vector<16x128xf32> to vector<16x128xbf16>
    %55 = math.tanh %54 : vector<16x128xbf16>
    %c0_23 = arith.constant 0 : index
    %c384 = arith.constant 384 : index
    %c0_24 = arith.constant 0 : index
    %56 = vector.load %arg4[%c0_23, %c384, %c0_24] : memref<1x512x128xbf16, #tpu.memory_space<vmem>>, vector<1x128x128xbf16>
    %57 = vector.shape_cast %56 : vector<1x128x128xbf16> to vector<128x128xbf16>
    %cst_25 = arith.constant dense<0.000000e+00> : vector<16x128xf32>
    %58 = tpu.matmul %55, %57, %cst_25 {dimension_numbers = #tpu.dot_dimension_numbers<[1], [0], [0], [1], [0, 0, 1, 1], [], []>} : vector<16x128xbf16>, vector<128x128xbf16>, vector<16x128xf32> -> vector<16x128xf32>
    %59 = vector.extract_strided_slice %23 {offsets = [4, 0], sizes = [1, 128], strides = [1, 1]} : vector<5x128xf32> to vector<1x128xf32>
    %60 = vector.broadcast %59 : vector<1x128xf32> to vector<16x128xf32>
    %61 = arith.addf %58, %60 : vector<16x128xf32>
    %62 = arith.truncf %61 : vector<16x128xf32> to vector<16x128xbf16>
    %c0_26 = arith.constant 0 : index
    %c0_27 = arith.constant 0 : index
    %63 = vector.load %arg6[%c0_26, %c0_27] : memref<16x128xbf16, #tpu.memory_space<vmem>>, vector<16x128xbf16>
    tpu.vector_store %arg6[%c0_26, %c0_27], %62 {strides = array<i32>} : memref<16x128xbf16, #tpu.memory_space<vmem>>, vector<16x128xbf16>,
    return
  }
  func.func @transform_0(%arg0: i32, %arg1: memref<1xi32, #tpu.memory_space<smem>>) -> (i32, i32) {
    %c0_i32 = arith.constant 0 : i32
    %c0_i32_0 = arith.constant 0 : i32
    return %arg0, %c0_i32 : i32, i32
  }
  func.func @transform_1(%arg0: i32, %arg1: memref<1xi32, #tpu.memory_space<smem>>) -> (i32, i32, i32) {
    %c0 = arith.constant 0 : index
    %0 = memref.load %arg1[%c0] : memref<1xi32, #tpu.memory_space<smem>>
    %c0_i32 = arith.constant 0 : i32
    %c0_i32_0 = arith.constant 0 : i32
    %c0_i32_1 = arith.constant 0 : i32
    return %0, %c0_i32, %c0_i32_0 : i32, i32, i32
  }
  func.func @transform_2(%arg0: i32, %arg1: memref<1xi32, #tpu.memory_space<smem>>) -> (i32, i32, i32) {
    %c0 = arith.constant 0 : index
    %0 = memref.load %arg1[%c0] : memref<1xi32, #tpu.memory_space<smem>>
    %c0_i32 = arith.constant 0 : i32
    %c0_i32_0 = arith.constant 0 : i32
    %c0_i32_1 = arith.constant 0 : i32
    return %0, %c0_i32, %c0_i32_0 : i32, i32, i32
  }
  func.func @transform_3(%arg0: i32, %arg1: memref<1xi32, #tpu.memory_space<smem>>) -> (i32, i32, i32) {
    %c0 = arith.constant 0 : index
    %0 = memref.load %arg1[%c0] : memref<1xi32, #tpu.memory_space<smem>>
    %c0_i32 = arith.constant 0 : i32
    %c0_i32_0 = arith.constant 0 : i32
    %c0_i32_1 = arith.constant 0 : i32
    return %0, %c0_i32, %c0_i32_0 : i32, i32, i32
  }
  func.func @transform_4(%arg0: i32, %arg1: memref<1xi32, #tpu.memory_space<smem>>) -> (i32, i32) {
    %c0_i32 = arith.constant 0 : i32
    %c0_i32_0 = arith.constant 0 : i32
    return %arg0, %c0_i32 : i32, i32
  }
}

</mosaic_0001>

<bundles_post_ra>
// kernel: tpu_custom_call.1
= control target key start
LH: loop header
LB: loop body
LE: loop exit
PB: predicated region body
PF: predicated region fallthrough
CT: control target
= control target key end

     0   :  { %11 = vsyncpa [#allocation5], 0  ;;  %s1083_s0 = inlined_call_operand.<no memory space> [shape: s32[1], index: 0, kind: input, shape index: {}]   ;;  %s1084_s1 = inlined_call_operand.vmem [shape: f32[16,16], index: 1, kind: input, shape index: {}]   ;;  %s1085_s2 = inlined_call_operand.vmem [shape: bf16[3,16,128], index: 2, kind: input, shape index: {}]   ;;  %s1086_s3 = inlined_call_operand.hbm [shape: bf16[3,512,128], index: 3, kind: input, shape index: {}]   ;;  %s1087_s4 = inlined_call_operand.vmem [shape: f32[3,5,128], index: 4, kind: input, shape index: {}]   ;;  %s1088_s5 = inlined_call_operand.hbm [shape: bf16[16,128], index: 5, kind: output, shape index: {}]  }
   0x1   :  { %12 = vsyncpa [#allocation6], 0  ;;  %s696_s20 = sshll.u32 %s1083_s0, 12  ;;  %s930_s24 = smov [#allocation4]  }
   0x2   :  { %s32_s23 = scalar_lea.hbm %s1086_s3, %s696_s20  ;;  %s33_s25 = sshll.u32 %s930_s24, 4  ;;  %s34_s25 = int_to_ptr.vmem [resolvable:$true] %s33_s25 }
   0x3   :  { %s880_s26 = scalar_lea.hbm %s32_s23, 4096  ;;  %s882_s29 = scalar_lea.hbm %s1086_s3, 12288 }
   0x4   :  { %p881_p0 = scmp.ne.s32.totalorder %s32_s23, %s880_s26  ;;  %p883_p1 = scmp.lt.u32.totalorder %s32_s23, %s1086_s3 }
   0x5   :  { %p884_p2 = scmp.lt.u32.totalorder %s882_s29, %s880_s26  ;;  %p886_p4 = scmp.lt.u32.totalorder %s880_s26, %s32_s23 }
   0x7   :  { %p885_p3 = por %p884_p2, %p883_p1 }
   0x9   :  { %p887_p5 = por %p886_p4, %p885_p3 }
   0xb   :  { %p888_p6 = pnand %p887_p5, %p881_p0 }
   0xd   :  { %891 = shalt.err (!%p888_p6)
}
   0xe   :  { %s892_s7 = scalar_lea.vmem %s34_s25, 4096  ;;  %p897_p8 = scmp.lt.s32.totalorder %s34_s25, %s34_s25 }
   0xf   :  { %p893_p7 = scmp.ne.s32.totalorder %s34_s25, %s892_s7  ;;  %p898_p9 = scmp.lt.s32.totalorder %s892_s7, %s892_s7 }
  0x11   :  { %p899_p10 = por %p898_p9, %p897_p8 }
  0x13   :  { %p900_p11 = pnand %p899_p10, %p893_p7 }
  0x15   :  { %903 = shalt.err (!%p900_p11)
}
  0x16   :  { %s931_s8 = smov 64   ;;  %s932_s9 = smov 4  }
  0x17   :  { %39 = dma.hbm_to_vmem [thread:$0]  %s32_s23, 4096, %s34_s25, [#allocation5], %s931_s8, %s931_s8, %s932_s9  }
  0x18   :  { %926 = dma.done.wait [#allocation5], 4096  }
  0x19   :  { %927 = vsyncadd [#allocation5], 4294963200  ;;  %vm79_vm0 = vcmask 130048   ;;  %v77_v0 = vld [vmem:[%s1084_s1] sm:$0xff]  ;;  %v78_v1 = vld [vmem:[%s1084_s1 + $0x8] sm:$0xff]  ;;  %p63_p12 = scmp.lt.s32.totalorder %s1083_s0, 2  ;;  %v116_v44 = vlaneseq }
  0x1a   :  { %v80_v2 = vsel %vm79_vm0, %v77_v0, 0.0  ;;  %v86_v3 = vmul.f32 %v77_v0, %v77_v0  ;;  %v83_v4 = vsel %vm79_vm0, %v78_v1, 0.0  ;;  %v87_v5 = vmul.f32 %v78_v1, %v78_v1  ;;  %v836_v10 = vld [vmem:[#allocation4] sm:$0xff]   ;;  %v837_v11 = vld [vmem:[#allocation4 + $0x8] sm:$0xff]   ;;  %v838_v12 = vld [vmem:[#allocation4 + $0x10] sm:$0xff]  }
  0x1b   :  { %81 = vadd.xlane.f32.xlu0 %v80_v2  ;;  %v933_v8 = vmov 0.0   ;;  %vm934_vm1 = vmmov 0   ;;  %s1090_s0 = smov (!%p63_p12, %s1083_s0), 2  ;;  %v839_v36 = vld [vmem:[#allocation4 + $0x18] sm:$0xff]   ;;  %v840_v37 = vld [vmem:[#allocation4 + $0x20] sm:$0xff]   ;;  %v841_v38 = vld [vmem:[#allocation4 + $0x28] sm:$0xff]  }
  0x1c   :  { %v88_v6 = vsel %vm79_vm0, %v86_v3, 0.0  ;;  %v91_v7 = vsel %vm79_vm0, %v87_v5, 0.0  ;;  %743 = vmatprep.subr.bf16.mxu0 %v933_v8  ;;  %745 = vmatprep.mubr.msk.bf16.mxu0 %vm934_vm1, %v933_v8  ;;  %s697_s16 = sshll.u32 %s1090_s0, 3  ;;  %v842_v39 = vld [vmem:[#allocation4 + $0x30] sm:$0xff]   ;;  %v843_v40 = vld [vmem:[#allocation4 + $0x38] sm:$0xff]   ;;  %v844_v41 = vld [vmem:[#allocation4 + $0x40] sm:$0xff]  }
  0x1d   :  { %89 = vadd.xlane.f32.xlu1 %v88_v6  ;;  %749 = vmatprep.subr.bf16.mxu1 %v933_v8  ;;  %s67_s19 = scalar_lea.vmem %s1085_s2, %s697_s16  ;;  %v845_v42 = vld [vmem:[#allocation4 + $0x48] sm:$0xff]   ;;  %v846_v43 = vld [vmem:[#allocation4 + $0x50] sm:$0xff]   ;;  %v1026_v45 = vshrl.u32 %v116_v44, 7  ;;  %s74_s21 = scalar_lea.vmem %s1087_s4, %s697_s16  ;;  %v847_v57 = vld [vmem:[#allocation4 + $0x58] sm:$0xff]  }
  0x1e   :  { %765 = vmatprep.mubr.msk.bf16.mxu1 %vm934_vm1, %v933_v8  ;;  %v835_v9 = vld [vmem:[%s67_s19] sm:$0xff]   ;;  %750 = vmatpush3.bf16.msra.mxu1 %v836_v10  ;;  %v849_v59 = vld [vmem:[#allocation4 + $0x68] sm:$0xff]   ;;  %v850_v60 = vld [vmem:[#allocation4 + $0x70] sm:$0xff]   ;;  %s935_s0 = smov [#allocation7]  }
  0x1f   :  { %84 = vadd.xlane.f32.xlu0 %v83_v4  ;;  %744 = vmatpush3.bf16.msra.mxu0 %v835_v9  ;;  %v118_v46 = vsub.s32 0, %v1026_v45  ;;  %v1034_v47 = vld [vmem:[%s74_s21] sm:$0x1f]  ;;  %v851_v61 = vld [vmem:[#allocation4 + $0x78] sm:$0xff]   ;;  %v853_v63 = vld [vmem:[#allocation4 + $0x88] sm:$0xff]   ;;  %s629_s4 = sshll.u32 %s935_s0, 4  ;;  %s630_s4 = int_to_ptr.vmem [resolvable:$true] %s629_s4 }
  0x20   :  { %769 = vmatprep.subr.bf16.mxu0 %v933_v8  ;;  %751 = vmatprep.subr.bf16.mxu1 %v933_v8  ;;  %v848_v58 = vld [vmem:[#allocation4 + $0x60] sm:$0xff]   ;;  %s904_s22 = scalar_lea.vmem %s630_s4, 128  ;;  %p909_p0 = scmp.lt.s32.totalorder %s630_s4, %s630_s4 }
  0x21   :  { %92 = vadd.xlane.f32.xlu1 %v91_v7  ;;  %v119_v48 = vrot.slane %v1034_v47, %v118_v46  ;;  %v852_v62 = vld [vmem:[#allocation4 + $0x80] sm:$0xff]   ;;  %v523_v46 = vsub.s32 4, %v1026_v45  ;;  %p905_p13 = scmp.ne.s32.totalorder %s630_s4, %s904_s22  ;;  %p910_p1 = scmp.lt.s32.totalorder %s904_s22, %s904_s22 }
  0x22   :  { %752 = vmatpush3.bf16.msra.mxu1 %v837_v11 }
  0x23   :  { %753 = vmatprep.subr.bf16.mxu1 %v933_v8  ;;  %p911_p2 = por %p910_p1, %p909_p0 }
  0x25   :  { %p912_p3 = pnand %p911_p2, %p905_p13 }
  0x26   :  { %754 = vmatpush3.bf16.msra.mxu1 %v838_v12  ;;  %v855_v12 = vld [vmem:[#allocation4 + $0x98] sm:$0xff]  }
  0x27   :  { %755 = vmatprep.subr.bf16.mxu1 %v933_v8 }
  0x2a   :  { %756 = vmatpush3.bf16.msra.mxu1 %v839_v36 }
  0x2b   :  { %757 = vmatprep.subr.bf16.mxu1 %v933_v8 }
  0x2e   :  { %758 = vmatpush3.bf16.msra.mxu1 %v840_v37 }
  0x2f   :  { %759 = vmatprep.subr.bf16.mxu1 %v933_v8 }
  0x32   :  { %760 = vmatpush3.bf16.msra.mxu1 %v841_v38 }
  0x33   :  { %761 = vmatprep.subr.bf16.mxu1 %v933_v8 }
  0x36   :  { %762 = vmatpush3.bf16.msra.mxu1 %v842_v39 }
  0x37   :  { %763 = vmatprep.subr.bf16.mxu1 %v933_v8 }
  0x3a   :  { %764 = vmatpush3.bf16.msra.mxu1 %v843_v40 }
  0x3b   :  { %789 = vmatprep.subr.bf16.mxu1 %v933_v8 }
  0xa8   :  { %v82_v13 = vpop.xlane.xlu0 %81 }
  0xa9   :  { %v94_v14 = vmul.f32 0.0625, %v82_v13  ;;  %v856_v13 = vld [vmem:[#allocation4 + $0xa0] sm:$0xff]  }
  0xaa   :  { %v90_v15 = vpop.xlane.xlu1 %89 }
  0xab   :  { %v98_v16 = vmul.f32 %v94_v14, %v94_v14  ;;  %v96_v17 = vmul.f32 0.0625, %v90_v15  ;;  %v104_v30 = vsub.f32 %v77_v0, %v94_v14  ;;  %v854_v0 = vld [vmem:[#allocation4 + $0x90] sm:$0xff]   ;;  %v857_v14 = vld [vmem:[#allocation4 + $0xa8] sm:$0xff]  }
  0xac   :  { %v85_v18 = vpop.xlane.xlu0 %84  ;;  %v858_v15 = vld [vmem:[#allocation4 + $0xb0] sm:$0xff]  }
  0xad   :  { %v100_v19 = vsub.f32 %v96_v17, %v98_v16  ;;  %v95_v20 = vmul.f32 0.0625, %v85_v18  ;;  %v859_v16 = vld [vmem:[#allocation4 + $0xb8] sm:$0xff]   ;;  %v860_v17 = vld [vmem:[#allocation4 + $0xc0] sm:$0xff]   ;;  %v861_v18 = vld [vmem:[#allocation4 + $0xc8] sm:$0xff]  }
  0xae   :  { %v93_v21 = vpop.xlane.xlu1 %92 }
  0xaf   :  { %v102_v22 = vmax.f32 %v100_v19, 0.0  ;;  %v99_v23 = vmul.f32 %v95_v20, %v95_v20  ;;  %v97_v24 = vmul.f32 0.0625, %v93_v21  ;;  %v105_v31 = vsub.f32 %v78_v1, %v95_v20  ;;  %v862_v19 = vld [vmem:[#allocation4 + $0xd0] sm:$0xff]  }
  0xb0   :  { %v190_v1 = vsub.s32 1, %v1026_v45  ;;  %v301_v20 = vsub.s32 2, %v1026_v45 }
  0xb1   :  { %v106_v25 = vadd.f32 1e-05, %v102_v22  ;;  %v101_v26 = vsub.f32 %v97_v24, %v99_v23 }
  0xb2   :  { %v191_v2 = vrot.slane %v1034_v47, %v190_v1  ;;  %v302_v21 = vrot.slane %v1034_v47, %v301_v20 }
  0xb3   :  { %v103_v27 = vmax.f32 %v101_v26, 0.0  ;;  %868 = vrsqrt.f32 %v106_v25 }
  0xb5   :  { %v107_v28 = vadd.f32 1e-05, %v103_v27 }
  0xb7   :  { %870 = vrsqrt.f32 %v107_v28 }
  0xbd   :  { %v869_v29 = vpop.eup %868 }
  0xbe   :  { %v110_v33 = vmul.f32 %v869_v29, %v104_v30  ;;  %v863_v30 = vld [vmem:[#allocation4 + $0xd8] sm:$0xff]  }
  0xc1   :  { %v871_v32 = vpop.eup %870 }
  0xc2   :  { %v111_v34 = vmul.f32 %v871_v32, %v105_v31  ;;  %v864_v31 = vld [vmem:[#allocation4 + $0xe0] sm:$0xff]   ;;  %v865_v32 = vld [vmem:[#allocation4 + $0xe8] sm:$0xff]  }
  0xc4   :  { %v112_v35 = vpack.c.bf16 %v111_v34, %v110_v33  ;;  %v866_v33 = vld [vmem:[#allocation4 + $0xf0] sm:$0xff]   ;;  %v867_v34 = vld [vmem:[#allocation4 + $0xf8] sm:$0xff]  }
  0xc6   :  { %746 = vmatmul.mubr.msk.bf16.vlgmr.msra.gmra.mrb[0].mxu0 %vm79_vm0, %v112_v35  ;;  %v412_v35 = vsub.s32 3, %v1026_v45 }
  0xc7   :  { %785 = vmatprep.mubr.msk.bf16.mxu0 %vm934_vm1, %v933_v8  ;;  %770 = vmatpush3.bf16.msra.mxu0 %v844_v41 }
  0xc8   :  { %771 = vmatprep.subr.bf16.mxu0 %v933_v8  ;;  %v413_v36 = vrot.slane %v1034_v47, %v412_v35 }
  0xcb   :  { %772 = vmatpush3.bf16.msra.mxu0 %v845_v42 }
  0xcc   :  { %773 = vmatprep.subr.bf16.mxu0 %v933_v8 }
  0xcf   :  { %774 = vmatpush3.bf16.msra.mxu0 %v846_v43 }
  0xd0   :  { %775 = vmatprep.subr.bf16.mxu0 %v933_v8 }
  0xd3   :  { %776 = vmatpush3.bf16.msra.mxu0 %v847_v57 }
  0xd4   :  { %777 = vmatprep.subr.bf16.mxu0 %v933_v8 }
  0xd7   :  { %778 = vmatpush3.bf16.msra.mxu0 %v848_v58 }
  0xd8   :  { %779 = vmatprep.subr.bf16.mxu0 %v933_v8 }
  0xdb   :  { %780 = vmatpush3.bf16.msra.mxu0 %v849_v59 }
  0xdc   :  { %781 = vmatprep.subr.bf16.mxu0 %v933_v8 }
  0xdf   :  { %782 = vmatpush3.bf16.msra.mxu0 %v850_v60 }
  0xe0   :  { %783 = vmatprep.subr.bf16.mxu0 %v933_v8 }
  0xe3   :  { %784 = vmatpush3.bf16.msra.mxu0 %v851_v61 }
  0xe4   :  { %809 = vmatprep.subr.bf16.mxu0 %v933_v8 }
 0x199   :  { %v163_v49 = vpop.f32.mrb[0].mxu0 }
 0x19a   :  { %v747_v50 = vpop.f32.mrb[1].mxu0  ;;  %v164_v52 = vadd.f32 %v163_v49, %v119_v48 }
 0x19b   :  { %v166_v51 = vpop.f32.mrb[2].mxu0 }
 0x19c   :  { %v167_v53 = vadd.f32 %v166_v51, %v119_v48  ;;  %v748_v54 = vpop.f32.mrb[3].mxu0  ;;  %v524_v48 = vrot.slane %v1034_v47, %v523_v46 }
 0x19e   :  { %v170_v55 = vpack.c.bf16 %v167_v53, %v164_v52 }
 0x1a0   :  { %872 = vtanh.bf16 %v170_v55 }
 0x1ab   :  { %v873_v56 = vpop.eup %872 }
 0x1ac   :  { %766 = vmatmul.mubr.bf16.vlgmr.msra.gmra.mrb[0].mxu1 %v873_v56 }
 0x1ad   :  { %805 = vmatprep.mubr.msk.bf16.mxu1 %vm934_vm1, %v933_v8  ;;  %790 = vmatpush3.bf16.msra.mxu1 %v852_v62 }
 0x1ae   :  { %791 = vmatprep.subr.bf16.mxu1 %v933_v8 }
 0x1b1   :  { %792 = vmatpush3.bf16.msra.mxu1 %v853_v63 }
 0x1b2   :  { %793 = vmatprep.subr.bf16.mxu1 %v933_v8 }
 0x1b5   :  { %794 = vmatpush3.bf16.msra.mxu1 %v854_v0 }
 0x1b6   :  { %795 = vmatprep.subr.bf16.mxu1 %v933_v8 }
 0x1b9   :  { %796 = vmatpush3.bf16.msra.mxu1 %v855_v12 }
 0x1ba   :  { %797 = vmatprep.subr.bf16.mxu1 %v933_v8 }
 0x1bd   :  { %798 = vmatpush3.bf16.msra.mxu1 %v856_v13 }
 0x1be   :  { %799 = vmatprep.subr.bf16.mxu1 %v933_v8 }
 0x1c1   :  { %800 = vmatpush3.bf16.msra.mxu1 %v857_v14 }
 0x1c2   :  { %801 = vmatprep.subr.bf16.mxu1 %v933_v8 }
 0x1c5   :  { %802 = vmatpush3.bf16.msra.mxu1 %v858_v15 }
 0x1c6   :  { %803 = vmatprep.subr.bf16.mxu1 %v933_v8 }
 0x1c9   :  { %804 = vmatpush3.bf16.msra.mxu1 %v859_v16 }
 0x27f   :  { %v274_v3 = vpop.f32.mrb[0].mxu1 }
 0x280   :  { %v767_v4 = vpop.f32.mrb[1].mxu1  ;;  %v275_v6 = vadd.f32 %v274_v3, %v191_v2 }
 0x281   :  { %v277_v5 = vpop.f32.mrb[2].mxu1 }
 0x282   :  { %v278_v7 = vadd.f32 %v277_v5, %v191_v2  ;;  %v768_v9 = vpop.f32.mrb[3].mxu1 }
 0x284   :  { %v281_v10 = vpack.c.bf16 %v278_v7, %v275_v6 }
 0x286   :  { %874 = vtanh.bf16 %v281_v10 }
 0x291   :  { %v875_v11 = vpop.eup %874 }
 0x292   :  { %786 = vmatmul.mubr.bf16.vlgmr.msra.gmra.mrb[4].mxu0 %v875_v11 }
 0x293   :  { %825 = vmatprep.mubr.msk.bf16.mxu0 %vm934_vm1, %v933_v8  ;;  %810 = vmatpush3.bf16.msra.mxu0 %v860_v17 }
 0x294   :  { %811 = vmatprep.subr.bf16.mxu0 %v933_v8 }
 0x297   :  { %812 = vmatpush3.bf16.msra.mxu0 %v861_v18 }
 0x298   :  { %813 = vmatprep.subr.bf16.mxu0 %v933_v8 }
 0x29b   :  { %814 = vmatpush3.bf16.msra.mxu0 %v862_v19 }
 0x29c   :  { %815 = vmatprep.subr.bf16.mxu0 %v933_v8 }
 0x29f   :  { %816 = vmatpush3.bf16.msra.mxu0 %v863_v30 }
 0x2a0   :  { %817 = vmatprep.subr.bf16.mxu0 %v933_v8 }
 0x2a3   :  { %818 = vmatpush3.bf16.msra.mxu0 %v864_v31 }
 0x2a4   :  { %819 = vmatprep.subr.bf16.mxu0 %v933_v8 }
 0x2a7   :  { %820 = vmatpush3.bf16.msra.mxu0 %v865_v32 }
 0x2a8   :  { %821 = vmatprep.subr.bf16.mxu0 %v933_v8 }
 0x2ab   :  { %822 = vmatpush3.bf16.msra.mxu0 %v866_v33 }
 0x2ac   :  { %823 = vmatprep.subr.bf16.mxu0 %v933_v8 }
 0x2af   :  { %824 = vmatpush3.bf16.msra.mxu0 %v867_v34 }
 0x365   :  { %v385_v22 = vpop.f32.mrb[4].mxu0 }
 0x366   :  { %v787_v23 = vpop.f32.mrb[5].mxu0  ;;  %v386_v25 = vadd.f32 %v385_v22, %v302_v21 }
 0x367   :  { %v388_v24 = vpop.f32.mrb[6].mxu0 }
 0x368   :  { %v389_v26 = vadd.f32 %v388_v24, %v302_v21  ;;  %v788_v27 = vpop.f32.mrb[7].mxu0 }
 0x36a   :  { %v392_v28 = vpack.c.bf16 %v389_v26, %v386_v25 }
 0x36c   :  { %876 = vtanh.bf16 %v392_v28 }
 0x377   :  { %v877_v29 = vpop.eup %876 }
 0x378   :  { %806 = vmatmul.mubr.bf16.vlgmr.msra.gmra.mrb[4].mxu1 %v877_v29 }
 0x44b   :  { %v496_v37 = vpop.f32.mrb[4].mxu1 }
 0x44c   :  { %v807_v38 = vpop.f32.mrb[5].mxu1  ;;  %v497_v40 = vadd.f32 %v496_v37, %v413_v36 }
 0x44d   :  { %v499_v39 = vpop.f32.mrb[6].mxu1 }
 0x44e   :  { %v500_v41 = vadd.f32 %v499_v39, %v413_v36  ;;  %v808_v42 = vpop.f32.mrb[7].mxu1 }
 0x450   :  { %v503_v43 = vpack.c.bf16 %v500_v41, %v497_v40 }
 0x452   :  { %878 = vtanh.bf16 %v503_v43 }
 0x45d   :  { %v879_v44 = vpop.eup %878 }
 0x45e   :  { %826 = vmatmul.mubr.bf16.vlgmr.msra.gmra.mrb[8].mxu0 %v879_v44 }
 0x531   :  { %v607_v8 = vpop.f32.mrb[8].mxu0 }
 0x532   :  { %v827_v49 = vpop.f32.mrb[9].mxu0  ;;  %v608_v51 = vadd.f32 %v607_v8, %v524_v48 }
 0x533   :  { %v610_v50 = vpop.f32.mrb[10].mxu0 }
 0x534   :  { %v611_v52 = vadd.f32 %v610_v50, %v524_v48  ;;  %v828_v53 = vpop.f32.mrb[11].mxu0 }
 0x536   :  { %v703_v54 = vpack.c.bf16 %v611_v52, %v608_v51 }
 0x538   :  { %704 = vst [vmem:[#allocation7] sm:$0xff] %v703_v54  }
 0x539   :  { %915 = shalt.err (!%p912_p3)
}
 0x53a   :  { %s916_s25 = scalar_lea.hbm %s1088_s5, 128 }
 0x53b   :  { %p917_p4 = scmp.ne.s32.totalorder %s1088_s5, %s916_s25  ;;  %p920_p5 = scmp.lt.u32.totalorder %s916_s25, %s1088_s5 }
 0x53d   :  { %p922_p6 = pnand %p920_p5, %p917_p4 }
 0x53f   :  { %925 = shalt.err (!%p922_p6)
}
 0x540   :  { %635 = dma.vmem_to_hbm [thread:$0]  %s630_s4, 128, %s1088_s5, [#allocation6], %s931_s8, %s931_s8, %s932_s9  }
 0x541   :  { %928 = dma.done.wait [#allocation6], 128  }
 0x542   :  { %929 = vsyncadd [#allocation6], 4294967168 }
 0x543   :  { %639 = vsyncpa [#allocation5], 1 }
 0x544   :  { %640 = vsyncpa [#allocation6], 1 }

</bundles_post_ra>
